<compile_context>
chip_gen: v6e
topology: v6e:2x2x1
jax: 0.10.0
libtpu: 0.0.40
codegen_flags: <defaults>
</compile_context>

<pallas_src>
import functools

import numpy as np

import jax
import jax.numpy as jnp
from jax.experimental import pallas as pl
from jax.experimental.pallas import tpu as pltpu


# ----------------------------------------------------------------------------
# Fused Pallas kernel (one grid step == one image)
# ----------------------------------------------------------------------------
def _convnn_kernel(x_ref, m1_ref, b1_ref, m2_ref, b2_ref, ml1_ref, bl1_ref,
                   wl2_ref, bl2_ref, o_ref, *, cin, k1, k2, cout1, cout2, p2h):
    """Whole ConvNN forward for one image; all weights resident in VMEM.

    x_ref:   (1, Cin, H, W) NCHW input block.
    m1_ref:  (k1, Cin*W, W1*Cout1)  block-Toeplitz conv1 weights (per di).
    m2_ref:  (k2, W1*Cout1, W2*Cout2) conv2 weights with pool1's even-column
             selection folded in as structural zeros (per di).
    ml1_ref: (P2h, W2*Cout2, hidden) Linear1 weights with pool2's column
             selection + torch NCHW flatten order folded in (per pooled row).
    b*_ref:  (1, n) biases tiled to the activation lane layout.
    o_ref:   (1, 1, n_classes) softmax output block.
    """
    f32 = jnp.float32

    def shift_rows(v, s):
        # result[i] = v[i + s]; wrapped rows land only where never consumed.
        return jnp.roll(v, -s, axis=0)

    def shift_lanes(v, s):
        return jnp.roll(v, -s, axis=1)

    # ---- NCHW -> (H, Cin*W): gather channels onto lanes in-kernel (lane = c*W + w)
    x2d = jnp.concatenate([x_ref[0, c] for c in range(cin)], axis=-1)

    # ---- conv1: Toeplitz matmul over (w, ci) per di, row-shift accumulation over di
    c1 = jnp.dot(x2d, m1_ref[0], preferred_element_type=f32)
    for di in range(1, k1):
        c1 = c1 + shift_rows(
            jnp.dot(x2d, m1_ref[di], preferred_element_type=f32), di)
    a1 = jnp.maximum(c1 + b1_ref[...], 0.0)            # (H, W1*Cout1), lane = wo*Cout1+co

    # ---- maxpool1 (2x2 / stride 2): shift+max; valid data at even rows / even wo
    t1 = jnp.maximum(a1, shift_rows(a1, 1))
    u1 = jnp.maximum(t1, shift_lanes(t1, cout1))

    # ---- conv2: Toeplitz matmuls; pool1's even-wo selection = zero rows of m2,
    #      row stride 2 from pool1 handled by 2*di row shifts.
    c2 = jnp.dot(u1, m2_ref[0], preferred_element_type=f32)
    for di in range(1, k2):
        c2 = c2 + shift_rows(
            jnp.dot(u1, m2_ref[di], preferred_element_type=f32), 2 * di)
    a2 = jnp.maximum(c2 + b2_ref[...], 0.0)            # (H, W2*Cout2), valid at even rows

    # ---- maxpool2
    t2 = jnp.maximum(a2, shift_rows(a2, 2))
    u2 = jnp.maximum(t2, shift_lanes(t2, cout2))       # valid at rows 4*hp, even wo2

    # ---- flatten + Linear1 (+ReLU): pool2's wo2 selection and the torch NCHW
    #      flatten order live inside ml1; only the 2 pooled rows are touched.
    hid = bl1_ref[...]
    for hp in range(p2h):
        row = u2[4 * hp:4 * hp + 1, :]                 # (1, W2*Cout2)
        hid = hid + jnp.dot(row, ml1_ref[hp], preferred_element_type=f32)
    hid = jnp.maximum(hid, 0.0)                        # (1, hidden)

    # ---- Linear2 + softmax(dim=1)
    logits = jnp.dot(hid, wl2_ref[...], preferred_element_type=f32) + bl2_ref[...]
    logits = logits - jnp.max(logits, axis=-1, keepdims=True)
    e = jnp.exp(logits)
    probs = e / jnp.sum(e, axis=-1, keepdims=True)     # (1, n_classes)
    o_ref[...] = probs[None, :, :]


# ----------------------------------------------------------------------------
# One-time parameter preparation (outside the per-forward hot path)
# ----------------------------------------------------------------------------
def prepare_params(conv_params, lin_params, input_hw):
    """Build block-Toeplitz / selection-folded matmul weights for the kernel."""
    (w1, b1), (w2, b2) = conv_params
    (wl1, bl1), (wl2, bl2) = lin_params
    H, W = int(input_hw[0]), int(input_hw[1])
    cout1, cin, k1, _ = (int(s) for s in w1.shape)
    cout2, _, k2, _ = (int(s) for s in w2.shape)
    W1 = W - k1 + 1                     # conv1 output width (14)
    P1w = W1 // 2                       # pool1 output width (7)
    W2 = P1w - k2 + 1                   # conv2 output width (5)
    P2w = W2 // 2                       # pool2 output width (2)
    H1 = H - k1 + 1
    P2h = ((H1 // 2) - k2 + 1) // 2     # pool2 output height (2)
    hidden = int(wl1.shape[0])

    # conv1 Toeplitz: m1[di, c*W + w, wo*Cout1 + co] = w1[co, c, di, w - wo]
    w_i = np.arange(W)[:, None, None]
    wo_i = np.arange(W1)[None, :, None]
    dj_i = np.arange(k1)[None, None, :]
    sel1 = (w_i == wo_i + dj_i).astype(np.float32)                 # (W, W1, k1)
    m1 = jnp.einsum('wuj,ocij->icwuo', jnp.asarray(sel1), w1)      # (k1,cin,W,W1,cout1)
    m1 = m1.reshape(k1, cin * W, W1 * cout1)

    # conv2 Toeplitz on the *unselected* pooled lanes:
    # m2[di, w1p*Cout1 + c, wo2*Cout2 + co2] = w2[co2, c, di, dj] iff w1p == 2*(wo2+dj)
    w1_i = np.arange(W1)[:, None, None]
    wo2_i = np.arange(W2)[None, :, None]
    dj2_i = np.arange(k2)[None, None, :]
    sel2 = (w1_i == 2 * (wo2_i + dj2_i)).astype(np.float32)        # (W1, W2, k2)
    m2 = jnp.einsum('wuj,ocij->iwcuo', jnp.asarray(sel2), w2)      # (k2,W1,cout1,W2,cout2)
    m2 = m2.reshape(k2, W1 * cout1, W2 * cout2)

    # Linear1 with pool2's column selection + torch NCHW flatten order folded in:
    # ml1[hp, wo2*Cout2 + co2, j] = wl1[j, co2*(P2h*P2w) + hp*P2w + wp] iff wo2 == 2*wp
    wl1r = wl1.reshape(hidden, cout2, P2h, P2w)
    wo2_s = np.arange(W2)[:, None]
    wp_s = np.arange(P2w)[None, :]
    sel3 = (wo2_s == 2 * wp_s).astype(np.float32)                  # (W2, P2w)
    ml1 = jnp.einsum('up,jchp->hucj', jnp.asarray(sel3), wl1r)     # (P2h,W2,cout2,hidden)
    ml1 = ml1.reshape(P2h, W2 * cout2, hidden)

    b1row = jnp.tile(b1, W1).reshape(1, -1)      # (1, W1*cout1)
    b2row = jnp.tile(b2, W2).reshape(1, -1)      # (1, W2*cout2)
    bl1row = bl1.reshape(1, -1)
    wl2m = jnp.transpose(wl2)
    bl2row = bl2.reshape(1, -1)

    params = (m1, b1row, m2, b2row, ml1, bl1row, wl2m, bl2row)
    meta = dict(cin=cin, k1=k1, k2=k2, cout1=cout1, cout2=cout2, p2h=P2h)
    return params, meta


# ----------------------------------------------------------------------------
# Wrapper: one pallas_call per forward, batch on a parallel grid axis
# ----------------------------------------------------------------------------
@functools.partial(jax.jit,
                   static_argnames=("cin", "k1", "k2", "cout1", "cout2", "p2h"))
def convnn_forward(x_nchw, params, *, cin, k1, k2, cout1, cout2, p2h):
    m1, b1row, m2, b2row, ml1, bl1row, wl2m, bl2row = params
    N = x_nchw.shape[0]
    n_cls = wl2m.shape[1]
    kernel = functools.partial(_convnn_kernel, cin=cin, k1=k1, k2=k2,
                               cout1=cout1, cout2=cout2, p2h=p2h)
    out = pl.pallas_call(
        kernel,
        out_shape=jax.ShapeDtypeStruct((N, 1, n_cls), jnp.float32),
        grid=(N,),
        in_specs=[
            pl.BlockSpec((1,) + tuple(x_nchw.shape[1:]), lambda n: (n, 0, 0, 0)),
            pl.BlockSpec(m1.shape, lambda n: (0, 0, 0)),
            pl.BlockSpec(b1row.shape, lambda n: (0, 0)),
            pl.BlockSpec(m2.shape, lambda n: (0, 0, 0)),
            pl.BlockSpec(b2row.shape, lambda n: (0, 0)),
            pl.BlockSpec(ml1.shape, lambda n: (0, 0, 0)),
            pl.BlockSpec(bl1row.shape, lambda n: (0, 0)),
            pl.BlockSpec(wl2m.shape, lambda n: (0, 0)),
            pl.BlockSpec(bl2row.shape, lambda n: (0, 0)),
        ],
        out_specs=pl.BlockSpec((1, 1, n_cls), lambda n: (n, 0, 0)),
        compiler_params=pltpu.CompilerParams(dimension_semantics=("parallel",)),
    )(x_nchw, m1, b1row, m2, b2row, ml1, bl1row, wl2m, bl2row)
    return out.reshape(N, n_cls)


# ----------------------------------------------------------------------------
# Pure-JAX reference (mirrors the PyTorch module) for correctness checking
# ----------------------------------------------------------------------------
def _reference_forward(x, conv_params, lin_params):
    hp = jax.lax.Precision.HIGHEST
    for (w, b) in conv_params:
        x = jax.lax.conv_general_dilated(
            x, w, window_strides=(1, 1), padding="VALID",
            dimension_numbers=("NCHW", "OIHW", "NCHW"), precision=hp)
        x = jnp.maximum(x + b[None, :, None, None], 0.0)
        x = jax.lax.reduce_window(x, -jnp.inf, jax.lax.max,
                                  (1, 1, 2, 2), (1, 1, 2, 2), "VALID")
    x = x.reshape(x.shape[0], -1)
    for i, (w, b) in enumerate(lin_params):
        x = jnp.dot(x, w.T, precision=hp) + b
        if i < len(lin_params) - 1:
            x = jnp.maximum(x, 0.0)
    return jax.nn.softmax(x, axis=1)


# ----------------------------------------------------------------------------
# Deterministic parameter init (PyTorch-default-like uniform bounds)
# ----------------------------------------------------------------------------
def _init_conv(key, cin, cout, k):
    kw_, kb = jax.random.split(key)
    bound = 1.0 / float(cin * k * k) ** 0.5
    w = jax.random.uniform(kw_, (cout, cin, k, k), jnp.float32, -bound, bound)
    b = jax.random.uniform(kb, (cout,), jnp.float32, -bound, bound)
    return w, b


def _init_linear(key, din, dout):
    kw_, kb = jax.random.split(key)
    bound = 1.0 / float(din) ** 0.5
    w = jax.random.uniform(kw_, (dout, din), jnp.float32, -bound, bound)
    b = jax.random.uniform(kb, (dout,), jnp.float32, -bound, bound)
    return w, b


if __name__ == "__main__":
    # ConvNN(ch=[4, 8, 16], ker=[3, 3], l=[64, 32, 10]) with input (2, 4, 16, 16):
    #   conv1 4->8  k3: 16x16 -> 14x14 -> pool -> 7x7
    #   conv2 8->16 k3: 7x7   -> 5x5   -> pool -> 2x2 (floor mode)
    #   flatten 16*2*2 = 64 ; linear 64->32 (relu) ; linear 32->10 (softmax)
    ch = [4, 8, 16]
    ker = [3, 3]
    lsz = [64, 32, 10]

    key = jax.random.PRNGKey(0)
    key, kx = jax.random.split(key)
    x = jax.random.normal(kx, (2, 4, 16, 16), jnp.float32)

    conv_params = []
    for i, k in enumerate(ker):
        key, sub = jax.random.split(key)
        conv_params.append(_init_conv(sub, ch[i], ch[i + 1], k))

    lin_params = []
    for i in range(len(lsz) - 1):
        key, sub = jax.random.split(key)
        lin_params.append(_init_linear(sub, lsz[i], lsz[i + 1]))

    params, meta = prepare_params(conv_params, lin_params, x.shape[2:])

    out = convnn_forward(x, params, **meta)
    out = jax.block_until_ready(out)

    ref = jax.block_until_ready(_reference_forward(x, conv_params, lin_params))

    assert out.shape == (2, 10), out.shape
    assert out.dtype == jnp.float32
    assert bool(jnp.all(jnp.abs(jnp.sum(out, axis=1) - 1.0) < 1e-4))  # softmax rows
    max_err = float(jnp.max(jnp.abs(out - ref)))
    assert max_err < 2e-3, max_err
    print("KERNEL_OK")
</pallas_src>

<mosaic_0001>
module attributes {stable_mosaic.version = 11 : i64} {
  func.func @_convnn_kernel(%arg0: i32, %arg1: memref<1x4x16x16xf32, #tpu.memory_space<vmem>>, %arg2: memref<3x64x112xf32, #tpu.memory_space<vmem>>, %arg3: memref<1x112xf32, #tpu.memory_space<vmem>>, %arg4: memref<3x112x80xf32, #tpu.memory_space<vmem>>, %arg5: memref<1x80xf32, #tpu.memory_space<vmem>>, %arg6: memref<2x80x32xf32, #tpu.memory_space<vmem>>, %arg7: memref<1x32xf32, #tpu.memory_space<vmem>>, %arg8: memref<32x10xf32, #tpu.memory_space<vmem>>, %arg9: memref<1x10xf32, #tpu.memory_space<vmem>>, %arg10: memref<1x1x10xf32, #tpu.memory_space<vmem>>) attributes {dimension_semantics = [#tpu.dimension_semantics<parallel>], iteration_bounds = array<i64: 2>, scalar_prefetch = 0 : i64, scratch_operands = 0 : i64, tpu.core_type = #tpu.core_type<tc>, window_params = [{transform_indices = @transform_0, window_bounds = array<i64: 1, 4, 16, 16>}, {pipeline_mode = #tpu.pipeline_mode<synchronous>, transform_indices = @transform_1, window_bounds = array<i64: 3, 64, 112>}, {pipeline_mode = #tpu.pipeline_mode<synchronous>, transform_indices = @transform_2, window_bounds = array<i64: 1, 112>}, {pipeline_mode = #tpu.pipeline_mode<synchronous>, transform_indices = @transform_3, window_bounds = array<i64: 3, 112, 80>}, {pipeline_mode = #tpu.pipeline_mode<synchronous>, transform_indices = @transform_4, window_bounds = array<i64: 1, 80>}, {pipeline_mode = #tpu.pipeline_mode<synchronous>, transform_indices = @transform_5, window_bounds = array<i64: 2, 80, 32>}, {pipeline_mode = #tpu.pipeline_mode<synchronous>, transform_indices = @transform_6, window_bounds = array<i64: 1, 32>}, {pipeline_mode = #tpu.pipeline_mode<synchronous>, transform_indices = @transform_7, window_bounds = array<i64: 32, 10>}, {pipeline_mode = #tpu.pipeline_mode<synchronous>, transform_indices = @transform_8, window_bounds = array<i64: 1, 10>}, {transform_indices = @transform_9, window_bounds = array<i64: 1, 1, 10>}]} {
    %c0 = arith.constant 0 : index
    %c0_0 = arith.constant 0 : index
    %c0_1 = arith.constant 0 : index
    %c0_2 = arith.constant 0 : index
    %0 = vector.load %arg1[%c0, %c0_0, %c0_1, %c0_2] : memref<1x4x16x16xf32, #tpu.memory_space<vmem>>, vector<1x1x16x16xf32>
    %1 = vector.shape_cast %0 : vector<1x1x16x16xf32> to vector<16x16xf32>
    %c0_3 = arith.constant 0 : index
    %c1 = arith.constant 1 : index
    %c0_4 = arith.constant 0 : index
    %c0_5 = arith.constant 0 : index
    %2 = vector.load %arg1[%c0_3, %c1, %c0_4, %c0_5] : memref<1x4x16x16xf32, #tpu.memory_space<vmem>>, vector<1x1x16x16xf32>
    %3 = vector.shape_cast %2 : vector<1x1x16x16xf32> to vector<16x16xf32>
    %c0_6 = arith.constant 0 : index
    %c2 = arith.constant 2 : index
    %c0_7 = arith.constant 0 : index
    %c0_8 = arith.constant 0 : index
    %4 = vector.load %arg1[%c0_6, %c2, %c0_7, %c0_8] : memref<1x4x16x16xf32, #tpu.memory_space<vmem>>, vector<1x1x16x16xf32>
    %5 = vector.shape_cast %4 : vector<1x1x16x16xf32> to vector<16x16xf32>
    %c0_9 = arith.constant 0 : index
    %c3 = arith.constant 3 : index
    %c0_10 = arith.constant 0 : index
    %c0_11 = arith.constant 0 : index
    %6 = vector.load %arg1[%c0_9, %c3, %c0_10, %c0_11] : memref<1x4x16x16xf32, #tpu.memory_space<vmem>>, vector<1x1x16x16xf32>
    %7 = vector.shape_cast %6 : vector<1x1x16x16xf32> to vector<16x16xf32>
    %8 = tpu.concatenate %1, %3, %5, %7 in 1 : vector<16x16xf32>, vector<16x16xf32>, vector<16x16xf32>, vector<16x16xf32> -> vector<16x64xf32>
    %c0_12 = arith.constant 0 : index
    %c0_13 = arith.constant 0 : index
    %c0_14 = arith.constant 0 : index
    %9 = vector.load %arg2[%c0_12, %c0_13, %c0_14] : memref<3x64x112xf32, #tpu.memory_space<vmem>>, vector<1x64x112xf32>
    %10 = vector.shape_cast %9 : vector<1x64x112xf32> to vector<64x112xf32>
    %cst = arith.constant dense<0.000000e+00> : vector<16x112xf32>
    %11 = tpu.matmul %8, %10, %cst {dimension_numbers = #tpu.dot_dimension_numbers<[1], [0], [0], [1], [0, 0, 1, 1], [], []>} : vector<16x64xf32>, vector<64x112xf32>, vector<16x112xf32> -> vector<16x112xf32>
    %c1_15 = arith.constant 1 : index
    %c0_16 = arith.constant 0 : index
    %c0_17 = arith.constant 0 : index
    %12 = vector.load %arg2[%c1_15, %c0_16, %c0_17] : memref<3x64x112xf32, #tpu.memory_space<vmem>>, vector<1x64x112xf32>
    %13 = vector.shape_cast %12 : vector<1x64x112xf32> to vector<64x112xf32>
    %cst_18 = arith.constant dense<0.000000e+00> : vector<16x112xf32>
    %14 = tpu.matmul %8, %13, %cst_18 {dimension_numbers = #tpu.dot_dimension_numbers<[1], [0], [0], [1], [0, 0, 1, 1], [], []>} : vector<16x64xf32>, vector<64x112xf32>, vector<16x112xf32> -> vector<16x112xf32>
    %15 = vector.extract_strided_slice %14 {offsets = [1, 0], sizes = [15, 112], strides = [1, 1]} : vector<16x112xf32> to vector<15x112xf32>
    %16 = vector.extract_strided_slice %14 {offsets = [0, 0], sizes = [1, 112], strides = [1, 1]} : vector<16x112xf32> to vector<1x112xf32>
    %17 = tpu.concatenate %15, %16 in 0 : vector<15x112xf32>, vector<1x112xf32> -> vector<16x112xf32>
    %18 = arith.addf %11, %17 : vector<16x112xf32>
    %c2_19 = arith.constant 2 : index
    %c0_20 = arith.constant 0 : index
    %c0_21 = arith.constant 0 : index
    %19 = vector.load %arg2[%c2_19, %c0_20, %c0_21] : memref<3x64x112xf32, #tpu.memory_space<vmem>>, vector<1x64x112xf32>
    %20 = vector.shape_cast %19 : vector<1x64x112xf32> to vector<64x112xf32>
    %cst_22 = arith.constant dense<0.000000e+00> : vector<16x112xf32>
    %21 = tpu.matmul %8, %20, %cst_22 {dimension_numbers = #tpu.dot_dimension_numbers<[1], [0], [0], [1], [0, 0, 1, 1], [], []>} : vector<16x64xf32>, vector<64x112xf32>, vector<16x112xf32> -> vector<16x112xf32>
    %22 = vector.extract_strided_slice %21 {offsets = [2, 0], sizes = [14, 112], strides = [1, 1]} : vector<16x112xf32> to vector<14x112xf32>
    %23 = vector.extract_strided_slice %21 {offsets = [0, 0], sizes = [2, 112], strides = [1, 1]} : vector<16x112xf32> to vector<2x112xf32>
    %24 = tpu.concatenate %22, %23 in 0 : vector<14x112xf32>, vector<2x112xf32> -> vector<16x112xf32>
    %25 = arith.addf %18, %24 : vector<16x112xf32>
    %c0_23 = arith.constant 0 : index
    %c0_24 = arith.constant 0 : index
    %26 = vector.load %arg3[%c0_23, %c0_24] : memref<1x112xf32, #tpu.memory_space<vmem>>, vector<1x112xf32>
    %27 = vector.broadcast %26 : vector<1x112xf32> to vector<16x112xf32>
    %28 = arith.addf %25, %27 : vector<16x112xf32>
    %cst_25 = arith.constant 0.000000e+00 : f32
    %29 = vector.broadcast %cst_25 : f32 to vector<16x112xf32>
    %30 = arith.maximumf %28, %29 : vector<16x112xf32>
    %31 = vector.extract_strided_slice %30 {offsets = [1, 0], sizes = [15, 112], strides = [1, 1]} : vector<16x112xf32> to vector<15x112xf32>
    %32 = vector.extract_strided_slice %30 {offsets = [0, 0], sizes = [1, 112], strides = [1, 1]} : vector<16x112xf32> to vector<1x112xf32>
    %33 = tpu.concatenate %31, %32 in 0 : vector<15x112xf32>, vector<1x112xf32> -> vector<16x112xf32>
    %34 = arith.maximumf %30, %33 : vector<16x112xf32>
    %35 = vector.extract_strided_slice %34 {offsets = [0, 8], sizes = [16, 104], strides = [1, 1]} : vector<16x112xf32> to vector<16x104xf32>
    %36 = vector.extract_strided_slice %34 {offsets = [0, 0], sizes = [16, 8], strides = [1, 1]} : vector<16x112xf32> to vector<16x8xf32>
    %37 = tpu.concatenate %35, %36 in 1 : vector<16x104xf32>, vector<16x8xf32> -> vector<16x112xf32>
    %38 = arith.maximumf %34, %37 : vector<16x112xf32>
    %c0_26 = arith.constant 0 : index
    %c0_27 = arith.constant 0 : index
    %c0_28 = arith.constant 0 : index
    %39 = vector.load %arg4[%c0_26, %c0_27, %c0_28] : memref<3x112x80xf32, #tpu.memory_space<vmem>>, vector<1x112x80xf32>
    %40 = vector.shape_cast %39 : vector<1x112x80xf32> to vector<112x80xf32>
    %cst_29 = arith.constant dense<0.000000e+00> : vector<16x80xf32>
    %41 = tpu.matmul %38, %40, %cst_29 {dimension_numbers = #tpu.dot_dimension_numbers<[1], [0], [0], [1], [0, 0, 1, 1], [], []>} : vector<16x112xf32>, vector<112x80xf32>, vector<16x80xf32> -> vector<16x80xf32>
    %c1_30 = arith.constant 1 : index
    %c0_31 = arith.constant 0 : index
    %c0_32 = arith.constant 0 : index
    %42 = vector.load %arg4[%c1_30, %c0_31, %c0_32] : memref<3x112x80xf32, #tpu.memory_space<vmem>>, vector<1x112x80xf32>
    %43 = vector.shape_cast %42 : vector<1x112x80xf32> to vector<112x80xf32>
    %cst_33 = arith.constant dense<0.000000e+00> : vector<16x80xf32>
    %44 = tpu.matmul %38, %43, %cst_33 {dimension_numbers = #tpu.dot_dimension_numbers<[1], [0], [0], [1], [0, 0, 1, 1], [], []>} : vector<16x112xf32>, vector<112x80xf32>, vector<16x80xf32> -> vector<16x80xf32>
    %45 = vector.extract_strided_slice %44 {offsets = [2, 0], sizes = [14, 80], strides = [1, 1]} : vector<16x80xf32> to vector<14x80xf32>
    %46 = vector.extract_strided_slice %44 {offsets = [0, 0], sizes = [2, 80], strides = [1, 1]} : vector<16x80xf32> to vector<2x80xf32>
    %47 = tpu.concatenate %45, %46 in 0 : vector<14x80xf32>, vector<2x80xf32> -> vector<16x80xf32>
    %48 = arith.addf %41, %47 : vector<16x80xf32>
    %c2_34 = arith.constant 2 : index
    %c0_35 = arith.constant 0 : index
    %c0_36 = arith.constant 0 : index
    %49 = vector.load %arg4[%c2_34, %c0_35, %c0_36] : memref<3x112x80xf32, #tpu.memory_space<vmem>>, vector<1x112x80xf32>
    %50 = vector.shape_cast %49 : vector<1x112x80xf32> to vector<112x80xf32>
    %cst_37 = arith.constant dense<0.000000e+00> : vector<16x80xf32>
    %51 = tpu.matmul %38, %50, %cst_37 {dimension_numbers = #tpu.dot_dimension_numbers<[1], [0], [0], [1], [0, 0, 1, 1], [], []>} : vector<16x112xf32>, vector<112x80xf32>, vector<16x80xf32> -> vector<16x80xf32>
    %52 = vector.extract_strided_slice %51 {offsets = [4, 0], sizes = [12, 80], strides = [1, 1]} : vector<16x80xf32> to vector<12x80xf32>
    %53 = vector.extract_strided_slice %51 {offsets = [0, 0], sizes = [4, 80], strides = [1, 1]} : vector<16x80xf32> to vector<4x80xf32>
    %54 = tpu.concatenate %52, %53 in 0 : vector<12x80xf32>, vector<4x80xf32> -> vector<16x80xf32>
    %55 = arith.addf %48, %54 : vector<16x80xf32>
    %c0_38 = arith.constant 0 : index
    %c0_39 = arith.constant 0 : index
    %56 = vector.load %arg5[%c0_38, %c0_39] : memref<1x80xf32, #tpu.memory_space<vmem>>, vector<1x80xf32>
    %57 = vector.broadcast %56 : vector<1x80xf32> to vector<16x80xf32>
    %58 = arith.addf %55, %57 : vector<16x80xf32>
    %cst_40 = arith.constant 0.000000e+00 : f32
    %59 = vector.broadcast %cst_40 : f32 to vector<16x80xf32>
    %60 = arith.maximumf %58, %59 : vector<16x80xf32>
    %61 = vector.extract_strided_slice %60 {offsets = [2, 0], sizes = [14, 80], strides = [1, 1]} : vector<16x80xf32> to vector<14x80xf32>
    %62 = vector.extract_strided_slice %60 {offsets = [0, 0], sizes = [2, 80], strides = [1, 1]} : vector<16x80xf32> to vector<2x80xf32>
    %63 = tpu.concatenate %61, %62 in 0 : vector<14x80xf32>, vector<2x80xf32> -> vector<16x80xf32>
    %64 = arith.maximumf %60, %63 : vector<16x80xf32>
    %65 = vector.extract_strided_slice %64 {offsets = [0, 16], sizes = [16, 64], strides = [1, 1]} : vector<16x80xf32> to vector<16x64xf32>
    %66 = vector.extract_strided_slice %64 {offsets = [0, 0], sizes = [16, 16], strides = [1, 1]} : vector<16x80xf32> to vector<16x16xf32>
    %67 = tpu.concatenate %65, %66 in 1 : vector<16x64xf32>, vector<16x16xf32> -> vector<16x80xf32>
    %68 = arith.maximumf %64, %67 : vector<16x80xf32>
    %c0_41 = arith.constant 0 : index
    %c0_42 = arith.constant 0 : index
    %69 = vector.load %arg7[%c0_41, %c0_42] : memref<1x32xf32, #tpu.memory_space<vmem>>, vector<1x32xf32>
    %70 = vector.extract_strided_slice %68 {offsets = [0, 0], sizes = [1, 80], strides = [1, 1]} : vector<16x80xf32> to vector<1x80xf32>
    %c0_43 = arith.constant 0 : index
    %c0_44 = arith.constant 0 : index
    %c0_45 = arith.constant 0 : index
    %71 = vector.load %arg6[%c0_43, %c0_44, %c0_45] : memref<2x80x32xf32, #tpu.memory_space<vmem>>, vector<1x80x32xf32>
    %72 = vector.shape_cast %71 : vector<1x80x32xf32> to vector<80x32xf32>
    %cst_46 = arith.constant dense<0.000000e+00> : vector<1x32xf32>
    %73 = tpu.matmul %70, %72, %cst_46 {dimension_numbers = #tpu.dot_dimension_numbers<[1], [0], [0], [1], [0, 0, 1, 1], [], []>} : vector<1x80xf32>, vector<80x32xf32>, vector<1x32xf32> -> vector<1x32xf32>
    %74 = arith.addf %69, %73 : vector<1x32xf32>
    %75 = vector.extract_strided_slice %68 {offsets = [4, 0], sizes = [1, 80], strides = [1, 1]} : vector<16x80xf32> to vector<1x80xf32>
    %c1_47 = arith.constant 1 : index
    %c0_48 = arith.constant 0 : index
    %c0_49 = arith.constant 0 : index
    %76 = vector.load %arg6[%c1_47, %c0_48, %c0_49] : memref<2x80x32xf32, #tpu.memory_space<vmem>>, vector<1x80x32xf32>
    %77 = vector.shape_cast %76 : vector<1x80x32xf32> to vector<80x32xf32>
    %cst_50 = arith.constant dense<0.000000e+00> : vector<1x32xf32>
    %78 = tpu.matmul %75, %77, %cst_50 {dimension_numbers = #tpu.dot_dimension_numbers<[1], [0], [0], [1], [0, 0, 1, 1], [], []>} : vector<1x80xf32>, vector<80x32xf32>, vector<1x32xf32> -> vector<1x32xf32>
    %79 = arith.addf %74, %78 : vector<1x32xf32>
    %cst_51 = arith.constant 0.000000e+00 : f32
    %80 = vector.broadcast %cst_51 : f32 to vector<1x32xf32>
    %81 = arith.maximumf %79, %80 : vector<1x32xf32>
    %c0_52 = arith.constant 0 : index
    %c0_53 = arith.constant 0 : index
    %82 = vector.load %arg8[%c0_52, %c0_53] : memref<32x10xf32, #tpu.memory_space<vmem>>, vector<32x10xf32>
    %cst_54 = arith.constant dense<0.000000e+00> : vector<1x10xf32>
    %83 = tpu.matmul %81, %82, %cst_54 {dimension_numbers = #tpu.dot_dimension_numbers<[1], [0], [0], [1], [0, 0, 1, 1], [], []>} : vector<1x32xf32>, vector<32x10xf32>, vector<1x10xf32> -> vector<1x10xf32>
    %c0_55 = arith.constant 0 : index
    %c0_56 = arith.constant 0 : index
    %84 = vector.load %arg9[%c0_55, %c0_56] : memref<1x10xf32, #tpu.memory_space<vmem>>, vector<1x10xf32>
    %85 = arith.addf %83, %84 : vector<1x10xf32>
    %cst_57 = arith.constant dense<0xFF800000> : vector<1xf32>
    %86 = vector.multi_reduction <maximumf>, %85, %cst_57 [1] : vector<1x10xf32> to vector<1xf32>
    %87 = vector.shape_cast %86 : vector<1xf32> to vector<1x1xf32>
    %88 = vector.broadcast %87 : vector<1x1xf32> to vector<1x10xf32>
    %89 = arith.subf %85, %88 : vector<1x10xf32>
    %90 = math.exp %89 : vector<1x10xf32>
    %cst_58 = arith.constant dense<0.000000e+00> : vector<1xf32>
    %91 = vector.multi_reduction <add>, %90, %cst_58 [1] : vector<1x10xf32> to vector<1xf32>
    %92 = vector.shape_cast %91 : vector<1xf32> to vector<1x1xf32>
    %93 = vector.broadcast %92 : vector<1x1xf32> to vector<1x10xf32>
    %94 = arith.divf %90, %93 : vector<1x10xf32>
    %95 = vector.shape_cast %94 : vector<1x10xf32> to vector<1x1x10xf32>
    %c0_59 = arith.constant 0 : index
    %c0_60 = arith.constant 0 : index
    %c0_61 = arith.constant 0 : index
    %96 = vector.load %arg10[%c0_59, %c0_60, %c0_61] : memref<1x1x10xf32, #tpu.memory_space<vmem>>, vector<1x1x10xf32>
    tpu.vector_store %arg10[%c0_59, %c0_60, %c0_61], %95 {strides = array<i32>} : memref<1x1x10xf32, #tpu.memory_space<vmem>>, vector<1x1x10xf32>,
    return
  }
  func.func @transform_0(%arg0: i32) -> (i32, i32, i32, i32) {
    %c0_i32 = arith.constant 0 : i32
    %c0_i32_0 = arith.constant 0 : i32
    %c0_i32_1 = arith.constant 0 : i32
    %c0_i32_2 = arith.constant 0 : i32
    return %arg0, %c0_i32, %c0_i32_0, %c0_i32_1 : i32, i32, i32, i32
  }
  func.func @transform_1(%arg0: i32) -> (i32, i32, i32) {
    %c0_i32 = arith.constant 0 : i32
    %c0_i32_0 = arith.constant 0 : i32
    %c0_i32_1 = arith.constant 0 : i32
    %c0_i32_2 = arith.constant 0 : i32
    return %c0_i32, %c0_i32_0, %c0_i32_1 : i32, i32, i32
  }
  func.func @transform_2(%arg0: i32) -> (i32, i32) {
    %c0_i32 = arith.constant 0 : i32
    %c0_i32_0 = arith.constant 0 : i32
    %c0_i32_1 = arith.constant 0 : i32
    return %c0_i32, %c0_i32_0 : i32, i32
  }
  func.func @transform_3(%arg0: i32) -> (i32, i32, i32) {
    %c0_i32 = arith.constant 0 : i32
    %c0_i32_0 = arith.constant 0 : i32
    %c0_i32_1 = arith.constant 0 : i32
    %c0_i32_2 = arith.constant 0 : i32
    return %c0_i32, %c0_i32_0, %c0_i32_1 : i32, i32, i32
  }
  func.func @transform_4(%arg0: i32) -> (i32, i32) {
    %c0_i32 = arith.constant 0 : i32
    %c0_i32_0 = arith.constant 0 : i32
    %c0_i32_1 = arith.constant 0 : i32
    return %c0_i32, %c0_i32_0 : i32, i32
  }
  func.func @transform_5(%arg0: i32) -> (i32, i32, i32) {
    %c0_i32 = arith.constant 0 : i32
    %c0_i32_0 = arith.constant 0 : i32
    %c0_i32_1 = arith.constant 0 : i32
    %c0_i32_2 = arith.constant 0 : i32
    return %c0_i32, %c0_i32_0, %c0_i32_1 : i32, i32, i32
  }
  func.func @transform_6(%arg0: i32) -> (i32, i32) {
    %c0_i32 = arith.constant 0 : i32
    %c0_i32_0 = arith.constant 0 : i32
    %c0_i32_1 = arith.constant 0 : i32
    return %c0_i32, %c0_i32_0 : i32, i32
  }
  func.func @transform_7(%arg0: i32) -> (i32, i32) {
    %c0_i32 = arith.constant 0 : i32
    %c0_i32_0 = arith.constant 0 : i32
    %c0_i32_1 = arith.constant 0 : i32
    return %c0_i32, %c0_i32_0 : i32, i32
  }
  func.func @transform_8(%arg0: i32) -> (i32, i32) {
    %c0_i32 = arith.constant 0 : i32
    %c0_i32_0 = arith.constant 0 : i32
    %c0_i32_1 = arith.constant 0 : i32
    return %c0_i32, %c0_i32_0 : i32, i32
  }
  func.func @transform_9(%arg0: i32) -> (i32, i32, i32) {
    %c0_i32 = arith.constant 0 : i32
    %c0_i32_0 = arith.constant 0 : i32
    %c0_i32_1 = arith.constant 0 : i32
    return %arg0, %c0_i32, %c0_i32_0 : i32, i32, i32
  }
}

</mosaic_0001>

<bundles_post_ra>
// kernel: convnn_forward.1
= control target key start
LH: loop header
LB: loop body
LE: loop exit
PB: predicated region body
PF: predicated region fallthrough
CT: control target
= control target key end

     0   :  { %14 = vsyncpa [#allocation3], 0  ;;  %s2360_s0 = inlined_call_operand.vmem [shape: f32[2,4,16,16], index: 0, kind: input, shape index: {}]   ;;  %s2361_s1 = inlined_call_operand.vmem [shape: f32[3,64,112], index: 1, kind: input, shape index: {}]   ;;  %s2362_s2 = inlined_call_operand.vmem [shape: f32[1,112], index: 2, kind: input, shape index: {}]   ;;  %s2363_s3 = inlined_call_operand.vmem [shape: f32[3,112,80], index: 3, kind: input, shape index: {}]   ;;  %s2364_s4 = inlined_call_operand.vmem [shape: f32[1,80], index: 4, kind: input, shape index: {}]   ;;  %s2365_s5 = inlined_call_operand.vmem [shape: f32[2,80,32], index: 5, kind: input, shape index: {}]   ;;  %s2366_s6 = inlined_call_operand.vmem [shape: f32[1,32], index: 6, kind: input, shape index: {}]   ;;  %s2367_s7 = inlined_call_operand.vmem [shape: f32[32,10], index: 7, kind: input, shape index: {}]   ;;  %s2368_s8 = inlined_call_operand.vmem [shape: f32[1,10], index: 8, kind: input, shape index: {}]   ;;  %s2369_s9 = inlined_call_operand.hbm [shape: f32[2,1,10], index: 9, kind: output, shape index: {}]  }
   0x1   :  { %16 = vsyncpa [#allocation3 + $0x1], 0  ;;  %s1923_s30 = smov 0   ;;  %s1925_s10 = smov 0  }
   0x2   :  { %s1927_s11 = smov 0   ;;  %s1929_s12 = smov 0  }
   0x3 LB: > { %s1944_s13 = sadd.s32 4294967295, %s1861_s12   ;;  %s1350_s14 = sadd.s32 4294967294, %s1861_s12   ;;  %s1861_s12 = sphi %s1929_s12, %s2375_s12   ;;  %s1857_s11 = sphi %s1927_s11, %s2374_s11   ;;  %s1853_s10 = sphi %s1925_s10, %s2373_s10   ;;  %s1849_s30 = sphi %s1923_s30, %s2372_s30  }
   0x4   : > { %s1948_s15 = sadd.s32 1, %s1861_s12   ;;  %s223_s16 = sadd.s32 1, %s1857_s11 }
   0x5   : > { %s220_s17 = ssub.s32 %s1861_s12, %s1948_s15  ;;  %p233_p0 = scmp.ne.s32.totalorder %s1857_s11, %s1853_s10 }
   0x6   : > { %p221_p1 = scmp.eq.s32.totalorder %s220_s17, 0  ;;  %p234_p2 = scmp.eq.s32.totalorder %s1944_s13, 1 }
   0x7   : > { %p239_p3 = scmp.ne.s32.totalorder %s1853_s10, %s1849_s30  ;;  %p240_p4 = scmp.eq.s32.totalorder %s1350_s14, 1 }
   0x8   : > { %s1959_s18 = scalar_select %p221_p1, %s1857_s11, %s223_s16  }
   0x9   : > { %p1961_p5 = por %p234_p2, %p233_p0  ;;  %p1965_p6 = por %p240_p4, %p239_p3 }
   0xa   : > { %p1353_p7 = scmp.ge.s32.totalorder %s1861_s12, 1  ;;  %p290_p8 = scmp.lt.s32.totalorder %s1861_s12, 3 }
   0xc   : > { %p291_p9 = pnand %p1353_p7, %p290_p8 }
   0xd   : > { %p325_p10 = scmp.lt.s32.totalorder (!%p291_p9), %s1944_s13, 1  ;;  %s1864_s16 = smov (!%p291_p9), 16  }
   0xe   : > { %294 = sbr.rel (%p291_p9) target bundleno = 1573 (0x625), region = 56  ;;  %s1865_s23 = smov (!%p291_p9), 48  }
   0xf   : > { %s1866_s17 = smov (!%p291_p9), 104   ;;  %s1867_s21 = smov (!%p291_p9), 120  }
  0x10   : > { %s1871_s14 = smov (!%p291_p9), 112   ;;  %s1872_s28 = smov (!%p291_p9), [#allocation2]  }
  0x13   : > { %v1369_v0 = vld [vmem:[%s2361_s1 + $0x78] sm:$0xff]  ;;  %v1368_v2 = vld [vmem:[%s2361_s1 + $0x70] sm:$0xff]  ;;  %s326_s29 = scalar_select %p325_p10, %s1944_s13, 1  ;;  %v1367_v4 = vld [vmem:[%s2361_s1 + $0x68] sm:$0xff]  ;;  %vm365_vm0 = vcmask 130048   ;;  %vm368_vm1 = vcmask 261120  }
  0x14   : > { %v381_v1 = vld [vmem:[%s2361_s1 + $0x38] sm:$0xff]  ;;  %1542 = vmatprep.subr.mxu0 %v1369_v0  ;;  %v380_v3 = vld [vmem:[%s2361_s1 + $0x30] sm:$0xff]  ;;  %v379_v5 = vld [vmem:[%s2361_s1 + $0x28] sm:$0xff]  ;;  %vm371_vm2 = vcmask 392192   ;;  %vm391_vm3 = vcmask 523264   ;;  %vm475_vm4 = vcmask 1046528  }
  0x15   : > { %1561 = vmatprep.subr.mxu1 %v381_v1  ;;  %1543 = vmatpush3.msra.mxu0 %v1369_v0  ;;  %s1436_s22 = sshll.u32 %s326_s29, 6  ;;  %v1366_v6 = vld [vmem:[%s2361_s1 + $0x60] sm:$0xff]  ;;  %s1863_s29 = smov 32   ;;  %v1365_v10 = vld [vmem:[%s2361_s1 + $0x58] sm:$0xff]  ;;  %v1364_v14 = vld [vmem:[%s2361_s1 + $0x50] sm:$0xff]  ;;  %vm644_vm5 = vcmask 1045504  }
  0x16   : > { %1562 = vmatpush3.msra.mxu1 %v381_v1  ;;  %1544 = vmatprep.subr.mxu0 %v1368_v2  ;;  %s1994_s25 = scalar_lea.vmem %s2360_s0, %s1436_s22  ;;  %v378_v7 = vld [vmem:[%s2361_s1 + $0x20] sm:$0xff]  ;;  %v377_v11 = vld [vmem:[%s2361_s1 + $0x18] sm:$0xff]  ;;  %v376_v15 = vld [vmem:[%s2361_s1 + $0x10] sm:$0xff]  ;;  %vm690_vm6 = vcmask 850944   ;;  %vm724_vm7 = vcmask 916480   ;;  %vm982_vm8 = vcmask 1043456  }
  0x17   : > { %1563 = vmatprep.subr.mxu1 %v380_v3  ;;  %1545 = vmatpush3.msra.mxu0 %v1368_v2  ;;  %v1358_v8 = vld [vmem:[%s1994_s25 + $0x20] sm:$0xff]  ;;  %v1356_v9 = vld [vmem:[%s1994_s25 + $0x10] sm:$0xff]  ;;  %v1359_v12 = vld [vmem:[%s1994_s25 + $0x28] sm:$0xff]  ;;  %vm1869_vm9 = vmmov 0   ;;  %vm1030_vm10 = vcmask 654336   ;;  %vm1269_vm11 = vcmask 73728  }
  0x18   : > { %1564 = vmatpush3.msra.mxu1 %v380_v3  ;;  %1546 = vmatprep.subr.mxu0 %v1367_v4  ;;  %v1357_v13 = vld [vmem:[%s1994_s25 + $0x18] sm:$0xff]  ;;  %v1360_v17 = vld [vmem:[%s1994_s25 + $0x30] sm:$0xff]  ;;  %v1363_v18 = vld [vmem:[%s2361_s1 + $0x48] sm:$0xff] }
  0x19   : > { %1565 = vmatprep.subr.mxu1 %v379_v5  ;;  %1547 = vmatpush3.msra.mxu0 %v1367_v4  ;;  %v1361_v16 = vld [vmem:[%s1994_s25 + $0x38] sm:$0xff]  ;;  %v375_v19 = vld [vmem:[%s2361_s1 + $0x8] sm:$0xff]  ;;  %v1362_v20 = vld [vmem:[%s2361_s1 + $0x40] sm:$0xff] }
  0x1a   : > { %1566 = vmatpush3.msra.mxu1 %v379_v5  ;;  %351 = vrot.lane.b32.xlu1 %v1358_v8, %s1863_s29  ;;  %v374_v21 = vld [vmem:[%s2361_s1] sm:$0xff]  ;;  %v1381_v22 = vld [vmem:[%s2361_s1 + $0xb8] sm:$0xff]  ;;  %v331_v26 = vld [vmem:[%s1994_s25 + $0x8] sm:$0xff] }
  0x1b   : > { %343 = vrot.lane.b32.xlu0 %v1356_v9, %s1864_s16  ;;  %1548 = vmatprep.subr.mxu0 %v1366_v6  ;;  %v330_v25 = vld [vmem:[%s1994_s25] sm:$0xff]  ;;  %v1380_v37 = vld [vmem:[%s2361_s1 + $0xb0] sm:$0xff]  ;;  %v1379_v38 = vld [vmem:[%s2361_s1 + $0xa8] sm:$0xff]  ;;  %s1870_s25 = smov 64  }
  0x1c   : > { %1567 = vmatprep.subr.mxu1 %v378_v7  ;;  %1549 = vmatpush3.msra.mxu0 %v1366_v6  ;;  %v1378_v39 = vld [vmem:[%s2361_s1 + $0xa0] sm:$0xff]  ;;  %v1377_v40 = vld [vmem:[%s2361_s1 + $0x98] sm:$0xff]  ;;  %v1376_v41 = vld [vmem:[%s2361_s1 + $0x90] sm:$0xff] }
  0x1d   : > { %1568 = vmatpush3.msra.mxu1 %v378_v7  ;;  %1550 = vmatprep.subr.mxu0 %v1365_v10  ;;  %v1375_v42 = vld [vmem:[%s2361_s1 + $0x88] sm:$0xff]  ;;  %v1374_v43 = vld [vmem:[%s2361_s1 + $0x80] sm:$0xff]  ;;  %v1398_v44 = vld [vmem:[%s2363_s3 + $0xd8] sm:$0xff] }
  0x1e   : > { %1569 = vmatprep.subr.mxu1 %v377_v11  ;;  %353 = vrot.lane.b32.xlu1 %v1359_v12, %s1863_s29  ;;  %v708_v45 = vld [vmem:[%s2363_s3 + $0x68] sm:$0xff]  ;;  %v1397_v46 = vld [vmem:[%s2363_s3 + $0xd0] sm:$0xff]  ;;  %v707_v47 = vld [vmem:[%s2363_s3 + $0x60] sm:$0xff] }
  0x1f   : > { %345 = vrot.lane.b32.xlu0 %v1357_v13, %s1864_s16  ;;  %1551 = vmatpush3.msra.mxu0 %v1365_v10  ;;  %v1396_v48 = vld [vmem:[%s2363_s3 + $0xc8] sm:$0xff]  ;;  %v706_v49 = vld [vmem:[%s2363_s3 + $0x58] sm:$0xff]  ;;  %v1395_v50 = vld [vmem:[%s2363_s3 + $0xc0] sm:$0xff] }
  0x20   : > { %1570 = vmatpush3.msra.mxu1 %v377_v11  ;;  %1552 = vmatprep.subr.mxu0 %v1364_v14  ;;  %v705_v51 = vld [vmem:[%s2363_s3 + $0x50] sm:$0xff]  ;;  %v1394_v52 = vld [vmem:[%s2363_s3 + $0xb8] sm:$0xff]  ;;  %v704_v53 = vld [vmem:[%s2363_s3 + $0x48] sm:$0xff] }
  0x21   : > { %1571 = vmatprep.subr.mxu1 %v376_v15  ;;  %1553 = vmatpush3.msra.mxu0 %v1364_v14  ;;  %v1393_v54 = vld [vmem:[%s2363_s3 + $0xb0] sm:$0xff]  ;;  %v703_v55 = vld [vmem:[%s2363_s3 + $0x40] sm:$0xff]  ;;  %v1392_v56 = vld [vmem:[%s2363_s3 + $0xa8] sm:$0xff] }
  0x22   : > { %1572 = vmatpush3.msra.mxu1 %v376_v15  ;;  %361 = vrot.lane.b32.xlu1 %v1361_v16, %s1865_s23  ;;  %v702_v57 = vld [vmem:[%s2363_s3 + $0x38] sm:$0xff]  ;;  %v1391_v58 = vld [vmem:[%s2363_s3 + $0xa0] sm:$0xff]  ;;  %v701_v59 = vld [vmem:[%s2363_s3 + $0x30] sm:$0xff] }
  0x23   : > { %359 = vrot.lane.b32.xlu0 %v1360_v17, %s1865_s23  ;;  %1554 = vmatprep.subr.mxu0 %v1363_v18  ;;  %v1390_v60 = vld [vmem:[%s2363_s3 + $0x98] sm:$0xff]  ;;  %v700_v61 = vld [vmem:[%s2363_s3 + $0x28] sm:$0xff]  ;;  %v1389_v62 = vld [vmem:[%s2363_s3 + $0x90] sm:$0xff] }
  0x24   : > { %1573 = vmatprep.subr.mxu1 %v375_v19  ;;  %1555 = vmatpush3.msra.mxu0 %v1363_v18  ;;  %v699_v63 = vld [vmem:[%s2363_s3 + $0x20] sm:$0xff]  ;;  %v1388_v0 = vld [vmem:[%s2363_s3 + $0x88] sm:$0xff]  ;;  %v698_v1 = vld [vmem:[%s2363_s3 + $0x18] sm:$0xff] }
  0x25   : > { %1574 = vmatpush3.msra.mxu1 %v375_v19  ;;  %1556 = vmatprep.subr.mxu0 %v1362_v20  ;;  %v1387_v14 = vld [vmem:[%s2363_s3 + $0x80] sm:$0xff]  ;;  %v697_v17 = vld [vmem:[%s2363_s3 + $0x10] sm:$0xff] }
  0x26   : > { %1575 = vmatprep.subr.mxu1 %v374_v21  ;;  %1557 = vmatpush3.msra.mxu0 %v1362_v20  ;;  %v1384_v20 = vld [vmem:[%s2362_s2] ss:$0 sm:$0xff] }
  0x27   : > { %1576 = vmatpush3.msra.mxu1 %v374_v21  ;;  %1580 = vmatprep.subr.mxu0 %v1381_v22  ;;  %v1386_v21 = vld [vmem:[%s2363_s3 + $0x78] sm:$0xff] }
  0x28   : > { %1599 = vmatprep.subr.mxu1 %v1398_v44 }
  0x8c   : > { %v352_v23 = vpop.permute.xlu1 %351 }
  0x8d   : > { %v344_v24 = vpop.permute.xlu0 %343 }
  0x8e   : > { %v366_v29 = vsel %vm365_vm0, %v330_v25, %v344_v24  ;;  %v1385_v25 = vld [vmem:[%s2363_s3 + $0x70] sm:$0xff] }
  0x8f   : > { %v369_v34 = vsel %vm368_vm1, %v366_v29, %v352_v23  ;;  %v1416_v29 = vld [vmem:[%s2363_s3 + $0x148] sm:$0xff] }
  0x90   : > { %v354_v27 = vpop.permute.xlu1 %353 }
  0x91   : > { %v346_v28 = vpop.permute.xlu0 %345 }
  0x92   : > { %v367_v30 = vsel %vm365_vm0, %v331_v26, %v346_v28  ;;  %v695_v28 = vld [vmem:[%s2363_s3] sm:$0xff] }
  0x93   : > { %v370_v32 = vsel %vm368_vm1, %v367_v30, %v354_v27 }
  0x94   : > { %v362_v31 = vpop.permute.xlu1 %361 }
  0x95   : > { %v360_v33 = vpop.permute.xlu0 %359  ;;  %v373_v35 = vsel %vm371_vm2, %v370_v32, %v362_v31 }
  0x96   : > { %v372_v36 = vsel %vm371_vm2, %v369_v34, %v360_v33 }
  0x97   : > { %1558 = vmatprep.mubr.msk.f32.mxu0 %vm391_vm3, %v372_v36  ;;  %1577 = vmatprep.mubr.msk.f32.mxu1 %vm391_vm3, %v372_v36 }
  0x98   : > { %1559 = vmatmul.mubr.msk.f32.vlgmr.msra.gmra.mxu0 %vm391_vm3, %v373_v35  ;;  %1578 = vmatmul.mubr.msk.f32.vlgmr.msra.gmra.mxu1 %vm391_vm3, %v373_v35 }
  0x99   : > { %1581 = vmatpush3.msra.mxu0 %v1381_v22  ;;  %1596 = vmatprep.mubr.msk.f32.mxu0 %vm391_vm3, %v372_v36  ;;  %v696_v22 = vld [vmem:[%s2363_s3 + $0x8] sm:$0xff] }
  0x9a   : > { %1582 = vmatprep.subr.mxu0 %v1380_v37  ;;  %1600 = vmatpush3.msra.mxu1 %v1398_v44 }
  0x9b   : > { %1583 = vmatpush3.msra.mxu0 %v1380_v37  ;;  %1601 = vmatprep.subr.mxu1 %v1397_v46 }
  0x9c   : > { %1584 = vmatprep.subr.mxu0 %v1379_v38  ;;  %1602 = vmatpush3.msra.mxu1 %v1397_v46  ;;  %v1415_v46 = vld [vmem:[%s2363_s3 + $0x140] sm:$0xff] }
  0x9d   : > { %1585 = vmatpush3.msra.mxu0 %v1379_v38  ;;  %1603 = vmatprep.subr.mxu1 %v1396_v48 }
  0x9e   : > { %1586 = vmatprep.subr.mxu0 %v1378_v39  ;;  %1604 = vmatpush3.msra.mxu1 %v1396_v48  ;;  %v1413_v48 = vld [vmem:[%s2363_s3 + $0x130] sm:$0xff] }
  0x9f   : > { %1587 = vmatpush3.msra.mxu0 %v1378_v39  ;;  %1605 = vmatprep.subr.mxu1 %v1395_v50 }
  0xa0   : > { %1588 = vmatprep.subr.mxu0 %v1377_v40  ;;  %1606 = vmatpush3.msra.mxu1 %v1395_v50  ;;  %v1411_v50 = vld [vmem:[%s2363_s3 + $0x120] sm:$0xff] }
  0xa1   : > { %1589 = vmatpush3.msra.mxu0 %v1377_v40  ;;  %1607 = vmatprep.subr.mxu1 %v1394_v52 }
  0xa2   : > { %1590 = vmatprep.subr.mxu0 %v1376_v41  ;;  %1608 = vmatpush3.msra.mxu1 %v1394_v52  ;;  %v1409_v52 = vld [vmem:[%s2363_s3 + $0x110] sm:$0xff] }
  0xa3   : > { %1591 = vmatpush3.msra.mxu0 %v1376_v41  ;;  %1609 = vmatprep.subr.mxu1 %v1393_v54 }
  0xa4   : > { %1592 = vmatprep.subr.mxu0 %v1375_v42  ;;  %1610 = vmatpush3.msra.mxu1 %v1393_v54  ;;  %v1407_v54 = vld [vmem:[%s2363_s3 + $0x100] sm:$0xff] }
  0xa5   : > { %1593 = vmatpush3.msra.mxu0 %v1375_v42  ;;  %1611 = vmatprep.subr.mxu1 %v1392_v56 }
  0xa6   : > { %1594 = vmatprep.subr.mxu0 %v1374_v43  ;;  %1612 = vmatpush3.msra.mxu1 %v1392_v56  ;;  %v1405_v56 = vld [vmem:[%s2363_s3 + $0xf0] sm:$0xff] }
  0xa7   : > { %1595 = vmatpush3.msra.mxu0 %v1374_v43  ;;  %1613 = vmatprep.subr.mxu1 %v1391_v58 }
  0xa8   : > { %1597 = vmatmul.mubr.msk.f32.vlgmr.msra.gmra.mxu0 %vm391_vm3, %v373_v35  ;;  %1630 = vmatprep.subr.mxu0 %v708_v45 }
  0xa9   : > { %1631 = vmatpush3.msra.mxu0 %v708_v45  ;;  %1614 = vmatpush3.msra.mxu1 %v1391_v58  ;;  %v1403_v58 = vld [vmem:[%s2363_s3 + $0xe0] sm:$0xff] }
  0xaa   : > { %1632 = vmatprep.subr.mxu0 %v707_v47  ;;  %1615 = vmatprep.subr.mxu1 %v1390_v60 }
  0xab   : > { %1633 = vmatpush3.msra.mxu0 %v707_v47  ;;  %1616 = vmatpush3.msra.mxu1 %v1390_v60  ;;  %v1414_v47 = vld [vmem:[%s2363_s3 + $0x138] sm:$0xff] }
  0xac   : > { %1634 = vmatprep.subr.mxu0 %v706_v49  ;;  %1617 = vmatprep.subr.mxu1 %v1389_v62  ;;  %v1430_v60 = vld [vmem:[%s2365_s5 + $0x98] sm:$0xff] }
  0xad   : > { %1635 = vmatpush3.msra.mxu0 %v706_v49  ;;  %1618 = vmatpush3.msra.mxu1 %v1389_v62  ;;  %v1412_v49 = vld [vmem:[%s2363_s3 + $0x128] sm:$0xff]  ;;  %v1028_v62 = vld [vmem:[%s2365_s5 + $0x40] sm:$0xff] }
  0xae   : > { %1636 = vmatprep.subr.mxu0 %v705_v51  ;;  %1619 = vmatprep.subr.mxu1 %v1388_v0 }
  0xaf   : > { %1637 = vmatpush3.msra.mxu0 %v705_v51  ;;  %1620 = vmatpush3.msra.mxu1 %v1388_v0  ;;  %v1410_v51 = vld [vmem:[%s2363_s3 + $0x118] sm:$0xff] }
  0xb0   : > { %1638 = vmatprep.subr.mxu0 %v704_v53  ;;  %1621 = vmatprep.subr.mxu1 %v1387_v14  ;;  %v1027_v0 = vld [vmem:[%s2365_s5 + $0x38] sm:$0xff] }
  0xb1   : > { %1639 = vmatpush3.msra.mxu0 %v704_v53  ;;  %1622 = vmatpush3.msra.mxu1 %v1387_v14  ;;  %v1408_v53 = vld [vmem:[%s2363_s3 + $0x108] sm:$0xff] }
  0xb2   : > { %1640 = vmatprep.subr.mxu0 %v703_v55  ;;  %1623 = vmatprep.subr.mxu1 %v1386_v21 }
  0xb3   : > { %1641 = vmatpush3.msra.mxu0 %v703_v55  ;;  %1624 = vmatpush3.msra.mxu1 %v1386_v21  ;;  %v1406_v55 = vld [vmem:[%s2363_s3 + $0xf8] sm:$0xff] }
  0xb4   : > { %1642 = vmatprep.subr.mxu0 %v702_v57  ;;  %1625 = vmatprep.subr.mxu1 %v1385_v25 }
  0xb5   : > { %1643 = vmatpush3.msra.mxu0 %v702_v57  ;;  %1626 = vmatpush3.msra.mxu1 %v1385_v25  ;;  %v1404_v57 = vld [vmem:[%s2363_s3 + $0xe8] sm:$0xff] }
  0xb6   : > { %1644 = vmatprep.subr.mxu0 %v701_v59  ;;  %1661 = vmatprep.subr.mxu1 %v1416_v29 }
  0xb7   : > { %1645 = vmatpush3.msra.mxu0 %v701_v59  ;;  %v1029_v59 = vld [vmem:[%s2365_s5 + $0x48] sm:$0xff] }
  0xb8   : > { %1646 = vmatprep.subr.mxu0 %v700_v61 }
  0xb9   : > { %1647 = vmatpush3.msra.mxu0 %v700_v61  ;;  %v1868_v61 = vmov 0.0  }
  0xba   : > { %1648 = vmatprep.subr.mxu0 %v699_v63 }
  0xbb   : > { %1649 = vmatpush3.msra.mxu0 %v699_v63  ;;  %v1429_v63 = vld [vmem:[%s2365_s5 + $0x90] sm:$0xff] }
  0xbc   : > { %1650 = vmatprep.subr.mxu0 %v698_v1 }
  0xbd   : > { %1651 = vmatpush3.msra.mxu0 %v698_v1  ;;  %v1428_v1 = vld [vmem:[%s2365_s5 + $0x88] sm:$0xff] }
  0xbe   : > { %1652 = vmatprep.subr.mxu0 %v697_v17 }
  0xbf   : > { %1653 = vmatpush3.msra.mxu0 %v697_v17 }
  0xc0   : > { %1654 = vmatprep.subr.mxu0 %v696_v22 }
  0xc1   : > { %1655 = vmatpush3.msra.mxu0 %v696_v22 }
  0xc2   : > { %1656 = vmatprep.subr.mxu0 %v695_v28 }
  0xc3   : > { %1657 = vmatpush3.msra.mxu0 %v695_v28 }
  0xc4   : > { %1692 = vmatprep.subr.mxu0 %v1868_v61 }
 0x158   : > { %v1560_v2 = vpop.f32.mrf.mxu0  ;;  %v1579_v6 = vpop.f32.mrf.mxu1 }
 0x159   : > { %v477_v5 = vrot.slane %v1560_v2, 1  ;;  %v1026_v2 = vld [vmem:[%s2365_s5 + $0x30] sm:$0xff] }
 0x15a   : > { %v464_v3 = vpop.f32.mrf.mxu0  ;;  %v549_v11 = vpop.f32.mrf.mxu1 }
 0x15b   : > { %v476_v4 = vrot.slane %v464_v3, 1  ;;  %v1427_v3 = vld [vmem:[%s2365_s5 + $0x80] sm:$0xff] }
 0x15d   : > { %v482_v8 = vsel %vm475_vm4, %v477_v5, %v476_v4  ;;  %v478_v9 = vsel %vm475_vm4, %v476_v4, %v477_v5  ;;  %v1025_v4 = vld [vmem:[%s2365_s5 + $0x28] sm:$0xff]  ;;  %v1426_v5 = vld [vmem:[%s2365_s5 + $0x78] sm:$0xff] }
 0x15e   : > { %v555_v15 = vadd.f32 %v1579_v6, %v482_v8  ;;  %v550_v16 = vadd.f32 %v549_v11, %v478_v9  ;;  %v1024_v6 = vld [vmem:[%s2365_s5 + $0x20] sm:$0xff]  ;;  %v1023_v8 = vld [vmem:[%s2365_s5 + $0x18] sm:$0xff]  ;;  %v1424_v9 = vld [vmem:[%s2365_s5 + $0x68] sm:$0xff] }
 0x168   : > { %v1598_v7 = vpop.f32.mrf.mxu0 }
 0x169   : > { %v646_v12 = vrot.slane %v1598_v7, 2  ;;  %v1425_v7 = vld [vmem:[%s2365_s5 + $0x70] sm:$0xff] }
 0x16a   : > { %v633_v10 = vpop.f32.mrf.mxu0 }
 0x16b   : > { %v645_v13 = vrot.slane %v633_v10, 2  ;;  %v1022_v10 = vld [vmem:[%s2365_s5 + $0x10] sm:$0xff] }
 0x16d   : > { %v647_v18 = vsel %vm644_vm5, %v645_v13, %v646_v12  ;;  %v651_v19 = vsel %vm644_vm5, %v646_v12, %v645_v13 }
 0x16e   : > { %v652_v23 = vadd.f32 %v647_v18, %v550_v16  ;;  %v653_v24 = vadd.f32 %v651_v19, %v555_v15 }
 0x170   : > { %v661_v26 = vadd.f32 %v1384_v20, %v652_v23  ;;  %v662_v27 = vadd.f32 %v1384_v20, %v653_v24  ;;  %v1021_v23 = vld [vmem:[%s2365_s5 + $0x8] sm:$0xff]  ;;  %v1423_v24 = vld [vmem:[%s2365_s5 + $0x60] sm:$0xff] }
 0x172   : > { %v663_v30 = vmax.f32 %v661_v26, 0.0  ;;  %v664_v31 = vmax.f32 %v662_v27, 0.0 }
 0x174   : > { %v667_v32 = vrot.slane %v663_v30, 1  ;;  %v668_v33 = vrot.slane %v664_v31, 1 }
 0x176   : > { %v669_v34 = vsel %vm475_vm4, %v667_v32, %v668_v33  ;;  %v673_v36 = vsel %vm475_vm4, %v668_v33, %v667_v32 }
 0x177   : > { %v674_v35 = vmax.f32 %v663_v30, %v669_v34  ;;  %v675_v37 = vmax.f32 %v664_v31, %v673_v36  ;;  %v1020_v30 = vld [vmem:[%s2365_s5] sm:$0xff]  ;;  %v1422_v31 = vld [vmem:[%s2365_s5 + $0x58] sm:$0xff]  ;;  %v1421_v34 = vld [vmem:[%s2365_s5 + $0x50] sm:$0xff] }
 0x179   : > { %684 = vrot.lane.b32.xlu1 %v674_v35, %s1866_s17  ;;  %678 = vrot.lane.b32.xlu0 %v674_v35, %s1867_s21 }
 0x17d   : > { %686 = vrot.lane.b32.xlu1 %v675_v37, %s1866_s17  ;;  %680 = vrot.lane.b32.xlu0 %v675_v37, %s1867_s21  ;;  %s323_s17 = sand.u32 1, %s1853_s10   ;;  %s1433_s21 = sshll.u32 %s1944_s13, 4 }
 0x17e   : > { %s324_s22 = scalar_lea.vmem [#allocation2], %s323_s17  ;;  %s1293_s24 = scalar_lea.hbm %s2369_s9, %s1433_s21 }
 0x17f   : > { %s1295_s23 = sshll.u32 %s324_s22, 4  ;;  %s1283_s26 = scalar_lea.sflag [#allocation3], %s323_s17  ;;  %s1296_s23 = int_to_ptr.vmem [resolvable:$true] %s1295_s23 }
 0x180   : > { %s1801_s27 = scalar_lea.vmem %s1296_s23, 16 }
 0x181   : > { %p1802_p11 = scmp.ne.s32.totalorder %s1296_s23, %s1801_s27 }
 0x183   : > { %p1803_p12 = pnand %p1802_p11, %p1961_p5 }
 0x185   : > { %p1804_p13 = pneg %p1803_p12 }
 0x1eb   : > { %v685_v38 = vpop.permute.xlu1 %684  ;;  %v679_v39 = vpop.permute.xlu0 %678 }
 0x1ec   : > { %v691_v40 = vsel %vm690_vm6, %v679_v39, %v685_v38 }
 0x1ed   : > { %v693_v41 = vmax.f32 %v674_v35, %v691_v40 }
 0x1ef   : > { %v687_v42 = vpop.permute.xlu1 %686  ;;  %1627 = vmatprep.mubr.msk.f32.mxu1 %vm724_vm7, %v693_v41  ;;  %1658 = vmatprep.mubr.msk.f32.mxu0 %vm724_vm7, %v693_v41  ;;  %v681_v43 = vpop.permute.xlu0 %680 }
 0x1f0   : > { %v692_v44 = vsel %vm690_vm6, %v681_v43, %v687_v42 }
 0x1f1   : > { %v694_v45 = vmax.f32 %v675_v37, %v692_v44 }
 0x1f3   : > { %1628 = vmatmul.mubr.msk.f32.vlgmr.msra.gmra.mxu1 %vm724_vm7, %v694_v45  ;;  %1659 = vmatmul.mubr.msk.f32.vlgmr.msra.gmra.mxu0 %vm724_vm7, %v694_v45 }
 0x1f4   : > { %1662 = vmatpush3.msra.mxu1 %v1416_v29  ;;  %1689 = vmatprep.mubr.msk.f32.mxu1 %vm724_vm7, %v693_v41  ;;  %v1419_v29 = vld [vmem:[%s2364_s4] ss:$0 sm:$0xff] }
 0x1f5   : > { %1663 = vmatprep.subr.mxu1 %v1415_v46  ;;  %1693 = vmatpush3.msra.mxu0 %v1029_v59 }
 0x1f6   : > { %1664 = vmatpush3.msra.mxu1 %v1415_v46  ;;  %1694 = vmatprep.subr.mxu0 %v1868_v61 }
 0x1f7   : > { %1665 = vmatprep.subr.mxu1 %v1414_v47  ;;  %1695 = vmatpush3.msra.mxu0 %v1028_v62 }
 0x1f8   : > { %1666 = vmatpush3.msra.mxu1 %v1414_v47  ;;  %1696 = vmatprep.subr.mxu0 %v1868_v61 }
 0x1f9   : > { %1667 = vmatprep.subr.mxu1 %v1413_v48  ;;  %1697 = vmatpush3.msra.mxu0 %v1027_v0 }
 0x1fa   : > { %1668 = vmatpush3.msra.mxu1 %v1413_v48  ;;  %1698 = vmatprep.subr.mxu0 %v1868_v61  ;;  %v1194_v48 = vld [vmem:[%s2367_s7 + $0x18] sm:$0xff] }
 0x1fb   : > { %1669 = vmatprep.subr.mxu1 %v1412_v49  ;;  %1699 = vmatpush3.msra.mxu0 %v1026_v2 }
 0x1fc   : > { %1670 = vmatpush3.msra.mxu1 %v1412_v49  ;;  %1700 = vmatprep.subr.mxu0 %v1868_v61  ;;  %v1193_v49 = vld [vmem:[%s2367_s7 + $0x10] sm:$0xff] }
 0x1fd   : > { %1671 = vmatprep.subr.mxu1 %v1411_v50  ;;  %1701 = vmatpush3.msra.mxu0 %v1025_v4 }
 0x1fe   : > { %1672 = vmatpush3.msra.mxu1 %v1411_v50  ;;  %1702 = vmatprep.subr.mxu0 %v1868_v61  ;;  %v1192_v50 = vld [vmem:[%s2367_s7 + $0x8] sm:$0xff] }
 0x1ff   : > { %1673 = vmatprep.subr.mxu1 %v1410_v51  ;;  %1703 = vmatpush3.msra.mxu0 %v1024_v6 }
 0x200   : > { %1674 = vmatpush3.msra.mxu1 %v1410_v51  ;;  %1704 = vmatprep.subr.mxu0 %v1868_v61  ;;  %v1191_v51 = vld [vmem:[%s2367_s7] sm:$0xff] }
 0x201   : > { %1675 = vmatprep.subr.mxu1 %v1409_v52  ;;  %1705 = vmatpush3.msra.mxu0 %v1023_v8 }
 0x202   : > { %1676 = vmatpush3.msra.mxu1 %v1409_v52  ;;  %1706 = vmatprep.subr.mxu0 %v1868_v61  ;;  %v1019_v52 = vld [vmem:[%s2366_s6] sm:$0x1] }
 0x203   : > { %1677 = vmatprep.subr.mxu1 %v1408_v53  ;;  %1707 = vmatpush3.msra.mxu0 %v1022_v10 }
 0x204   : > { %1678 = vmatpush3.msra.mxu1 %v1408_v53  ;;  %1708 = vmatprep.subr.mxu0 %v1868_v61 }
 0x205   : > { %1679 = vmatprep.subr.mxu1 %v1407_v54  ;;  %1709 = vmatpush3.msra.mxu0 %v1021_v23 }
 0x206   : > { %1680 = vmatpush3.msra.mxu1 %v1407_v54  ;;  %1710 = vmatprep.subr.mxu0 %v1868_v61 }
 0x207   : > { %1681 = vmatprep.subr.mxu1 %v1406_v55  ;;  %1711 = vmatpush3.msra.mxu0 %v1020_v30 }
 0x208   : > { %1682 = vmatpush3.msra.mxu1 %v1406_v55  ;;  %1712 = vmatprep.mubr.msk.f32.mxu0 %vm1869_vm9, %v1868_v61 }
 0x209   : > { %1683 = vmatprep.subr.mxu1 %v1405_v56  ;;  %1738 = vmatprep.subr.mxu0 %v1868_v61 }
 0x20a   : > { %1684 = vmatpush3.msra.mxu1 %v1405_v56 }
 0x20b   : > { %1685 = vmatprep.subr.mxu1 %v1404_v57 }
 0x20c   : > { %1686 = vmatpush3.msra.mxu1 %v1404_v57 }
 0x20d   : > { %1687 = vmatprep.subr.mxu1 %v1403_v58 }
 0x20e   : > { %1688 = vmatpush3.msra.mxu1 %v1403_v58 }
 0x20f   : > { %1690 = vmatmul.mubr.msk.f32.vlgmr.msra.gmra.mxu1 %vm724_vm7, %v694_v45  ;;  %1715 = vmatprep.subr.mxu1 %v1868_v61 }
 0x210   : > { %1716 = vmatpush3.msra.mxu1 %v1430_v60  ;;  %1735 = vmatprep.mubr.msk.f32.mxu1 %vm1869_vm9, %v1868_v61  ;;  %v1195_v60 = vld [vmem:[%s2368_s8] sm:$0x1] }
 0x211   : > { %1717 = vmatprep.subr.mxu1 %v1868_v61 }
 0x212   : > { %1718 = vmatpush3.msra.mxu1 %v1429_v63 }
 0x213   : > { %1719 = vmatprep.subr.mxu1 %v1868_v61 }
 0x214   : > { %1720 = vmatpush3.msra.mxu1 %v1428_v1 }
 0x215   : > { %1721 = vmatprep.subr.mxu1 %v1868_v61 }
 0x216   : > { %1722 = vmatpush3.msra.mxu1 %v1427_v3 }
 0x217   : > { %1723 = vmatprep.subr.mxu1 %v1868_v61 }
 0x218   : > { %1724 = vmatpush3.msra.mxu1 %v1426_v5 }
 0x219   : > { %1725 = vmatprep.subr.mxu1 %v1868_v61 }
 0x21a   : > { %1726 = vmatpush3.msra.mxu1 %v1425_v7 }
 0x21b   : > { %1727 = vmatprep.subr.mxu1 %v1868_v61 }
 0x21c   : > { %1728 = vmatpush3.msra.mxu1 %v1424_v9 }
 0x21d   : > { %1729 = vmatprep.subr.mxu1 %v1868_v61 }
 0x21e   : > { %1730 = vmatpush3.msra.mxu1 %v1423_v24 }
 0x21f   : > { %1731 = vmatprep.subr.mxu1 %v1868_v61 }
 0x220   : > { %1732 = vmatpush3.msra.mxu1 %v1422_v31 }
 0x221   : > { %1733 = vmatprep.subr.mxu1 %v1868_v61 }
 0x222   : > { %1734 = vmatpush3.msra.mxu1 %v1421_v34 }
 0x2b3   : > { %v1629_v11 = vpop.f32.mrf.mxu1  ;;  %v1660_v15 = vpop.f32.mrf.mxu0 }
 0x2b4   : > { %v809_v14 = vrot.slane %v1629_v11, 2 }
 0x2b5   : > { %v797_v12 = vpop.f32.mrf.mxu1  ;;  %v881_v20 = vpop.f32.mrf.mxu0 }
 0x2b6   : > { %v808_v13 = vrot.slane %v797_v12, 2 }
 0x2b8   : > { %v814_v17 = vsel %vm644_vm5, %v809_v14, %v808_v13  ;;  %v810_v18 = vsel %vm644_vm5, %v808_v13, %v809_v14 }
 0x2b9   : > { %v887_v25 = vadd.f32 %v1660_v15, %v814_v17  ;;  %v882_v26 = vadd.f32 %v881_v20, %v810_v18 }
 0x2cf   : > { %v1691_v16 = vpop.f32.mrf.mxu1 }
 0x2d0   : > { %v984_v21 = vrot.slane %v1691_v16, 4 }
 0x2d1   : > { %v971_v19 = vpop.f32.mrf.mxu1 }
 0x2d2   : > { %v983_v22 = vrot.slane %v971_v19, 4 }
 0x2d4   : > { %v985_v27 = vsel %vm982_vm8, %v983_v22, %v984_v21  ;;  %v989_v28 = vsel %vm982_vm8, %v984_v21, %v983_v22 }
 0x2d5   : > { %v990_v32 = vadd.f32 %v985_v27, %v882_v26  ;;  %v991_v33 = vadd.f32 %v989_v28, %v887_v25 }
 0x2d7   : > { %v999_v35 = vadd.f32 %v1419_v29, %v990_v32  ;;  %v1000_v36 = vadd.f32 %v1419_v29, %v991_v33 }
 0x2d9   : > { %v1001_v37 = vmax.f32 %v999_v35, 0.0  ;;  %v1002_v38 = vmax.f32 %v1000_v36, 0.0 }
 0x2db   : > { %v1005_v39 = vrot.slane %v1001_v37, 2  ;;  %v1006_v40 = vrot.slane %v1002_v38, 2 }
 0x2dd   : > { %v1007_v41 = vsel %vm644_vm5, %v1005_v39, %v1006_v40 }
 0x2de   : > { %v1009_v42 = vmax.f32 %v1001_v37, %v1007_v41 }
 0x2e0   : > { %1014 = vrot.lane.b32.xlu1 %v1009_v42, %s1870_s25  ;;  %1011 = vrot.lane.b32.xlu0 %v1009_v42, %s1871_s14  ;;  %s1805_s25 = sshll.u32 %s1872_s28, 4  ;;  %s1806_s25 = int_to_ptr.vmem [resolvable:$false] %s1805_s25 }
 0x2e1   : > { %s1807_s13 = scalar_lea.vmem %s1806_s25, 32  ;;  %p1808_p0 = scmp.lt.s32.totalorder %s1296_s23, %s1806_s25 }
 0x2e2   : > { %p1809_p1 = scmp.lt.s32.totalorder %s1807_s13, %s1801_s27 }
 0x2e4   : > { %p1810_p2 = por %p1809_p1, %p1808_p0 }
 0x2e6   : > { %p1811_p3 = pnand %p1810_p2, %p1804_p13 }
 0x352   : > { %v1015_v43 = vpop.permute.xlu1 %1014  ;;  %v1012_v44 = vpop.permute.xlu0 %1011 }
 0x353   : > { %v1017_v45 = vsel %vm391_vm3, %v1012_v44, %v1015_v43 }
 0x354   : > { %v1018_v46 = vmax.f32 %v1009_v42, %v1017_v45 }
 0x356   : > { %v1116_v47 = vrot.slane %v1018_v46, 4  ;;  %1713 = vmatmul.mubr.msk.f32.vlgmr.msra.gmra.mxu0 %vm1030_vm10, %v1018_v46 }
 0x357   : > { %1746 = vmatprep.mubr.msk.f32.mxu0 %vm1869_vm9, %v1868_v61  ;;  %1739 = vmatpush3.msra.mxu0 %v1194_v48 }
 0x358   : > { %1736 = vmatmul.mubr.msk.f32.vlgmr.msra.gmra.mxu1 %vm1030_vm10, %v1116_v47  ;;  %1740 = vmatprep.subr.mxu0 %v1868_v61 }
 0x359   : > { %1741 = vmatpush3.msra.mxu0 %v1193_v49 }
 0x35a   : > { %1742 = vmatprep.subr.mxu0 %v1868_v61 }
 0x35b   : > { %1743 = vmatpush3.msra.mxu0 %v1192_v50 }
 0x35c   : > { %1744 = vmatprep.subr.mxu0 %v1868_v61 }
 0x35d   : > { %1745 = vmatpush3.msra.mxu0 %v1191_v51 }
 0x416   : > { %v1100_v53 = vpop.f32.mrf.mxu0 }
 0x417   : > { %v1104_v54 = vadd.f32 %v1100_v53, %v1019_v52 }
 0x418   : > { %v1714_v55 = vpop.f32.mrf.mxu0  ;;  %v1185_v56 = vpop.f32.mrf.mxu1 }
 0x419   : > { %v1189_v57 = vadd.f32 %v1185_v56, %v1104_v54 }
 0x41a   : > { %v1737_v58 = vpop.f32.mrf.mxu1 }
 0x41b   : > { %v1190_v59 = vmax.f32 %v1189_v57, 0.0 }
 0x41d   : > { %1747 = vmatmul.mubr.msk.f32.vlgmr.msra.gmra.mxu0 %vm368_vm1, %v1190_v59 }
 0x4dd   : > { %v1265_v61 = vpop.f32.mrf.mxu0 }
 0x4de   : > { %v1266_v62 = vadd.f32 %v1265_v61, %v1195_v60 }
 0x4df   : > { %v1748_v63 = vpop.f32.mrf.mxu0 }
 0x4e0   : > { %v1270_v0 = vsel %vm1269_vm11, %v1266_v62, -inf }
 0x4e1   : > { %1271 = vmax.xlane.f32.xlu0 %v1270_v0 }
 0x56a   : > { %v1272_v1 = vpop.xlane.xlu0 %1271 }
 0x56b   : > { %v1273_v2 = vsub.f32 %v1266_v62, %v1272_v1 }
 0x56d   : > { %v1274_v3 = vmul.f32 1.442695, %v1273_v2 }
 0x56f   : > { %1797 = vpow2.f32 %v1274_v3 }
 0x57c   : > { %v1798_v4 = vpop.eup %1797 }
 0x57d   : > { %v1276_v5 = vsel %vm1269_vm11, %v1798_v4, 0.0 }
 0x57e   : > { %1277 = vadd.xlane.f32.xlu1 %v1276_v5 }
 0x607   : > { %v1278_v6 = vpop.xlane.xlu1 %1277 }
 0x608   : > { %1799 = vrcp.f32 %v1278_v6 }
 0x615   : > { %v1800_v7 = vpop.eup %1799 }
 0x616   : > { %v1280_v8 = vmul.f32 %v1800_v7, %v1798_v4 }
 0x618   : > { %1281 = vst.msk [vmem:[%s324_s22] sm:$0x1] %vm1269_vm11, %v1280_v8 }
 0x619   : > { %1814 = shalt.err (!%p1811_p3)
}
 0x61a   : > { %s1815_s14 = scalar_lea.hbm %s1293_s24, 16  ;;  %s1819_s22 = scalar_lea.hbm %s2369_s9, 32 }
 0x61b   : > { %p1816_p4 = scmp.ne.s32.totalorder %s1293_s24, %s1815_s14  ;;  %p1820_p9 = scmp.lt.s32.totalorder %s1293_s24, %s2369_s9 }
 0x61c   : > { %p1821_p10 = scmp.lt.s32.totalorder %s1819_s22, %s1815_s14 }
 0x61d   : > { %p1817_p7 = pnand %p1816_p4, %p1961_p5 }
 0x61e   : > { %p1822_p11 = por %p1821_p10, %p1820_p9 }
 0x61f   : > { %p1818_p8 = pneg %p1817_p7 }
 0x621   : > { %p1823_p12 = pnand %p1822_p11, %p1818_p8 }
 0x623   : > { %1826 = shalt.err (!%p1823_p12)
}
 0x624   : > { %1749 = dma.vmem_to_hbm [thread:$0]  (%p1961_p5), %s1296_s23, 16, %s1293_s24, %s1283_s26  }
 0x625 PF: > { %p1755_p13 = scmp.ge.s32.totalorder %s1861_s12, 2  ;;  %s1307_s27 = sand.u32 1, %s1849_s30  }
 0x626   : > { %s1308_s28 = scalar_lea.sflag [#allocation3], %s1307_s27 }
 0x627   : > { %p1752_p0 = pnand %p1755_p13, %p1965_p6 }
 0x629   : > { %p1753_p1 = pneg %p1752_p0 }
 0x62b   : > { %1844 = dma.done.wait (%p1753_p1), %s1308_s28, 16  }
 0x62c   : > { %1846 = vsyncadd (%p1753_p1), %s1308_s28, 4294967280  ;;  %p19_p2 = scmp.ge.s32.totalorder %s1948_s15, 4   ;;  %s2372_s30 = smov %s1853_s10 }
 0x62d   : > { %s2373_s10 = smov %s1857_s11  ;;  %s2374_s11 = smov %s1959_s18 }
 0x62e   : > { %s2375_s12 = smov %s1948_s15  ;;  %21 = sbr.rel (!%p19_p2) target bundleno = 3 (0x3), region = 99 }
 0x633   :  { %1312 = vsyncpa [#allocation3], 1 }
 0x634   :  { %1314 = vsyncpa [#allocation3 + $0x1], 1 }

</bundles_post_ra>
